<compile_context>
chip_gen: v7x
topology: tpu7x:2x2x1
jax: 0.10.0
libtpu: 0.0.40
codegen_flags: <defaults>
</compile_context>

<pallas_src>
import functools
import math

import jax
import jax.numpy as jnp
from jax import lax
from jax.experimental import pallas as pl
from jax.experimental.pallas import tpu as pltpu

# ----- static hyper-parameters of AMU_Model ---------------------------------
ALPHA = 1.0
UNCENT_POWER = 0.5
UNCENT_TYPE = "entropy"     # default setting in the repo
LAMBDA_MERGE = 0.7          # only used in the loss path (labels != None)
# TODO(synk): image encoders (clip_model / aux_model) and the cross-entropy loss path
#             (labels != None) are out of scope; this is the inference forward with
#             precomputed features (images=None, labels=None).


def _round_up(x, m):
    return (x + m - 1) // m * m


def _amu_kernel(cf_ref, af_ref, wclip_ref, wadpt_ref, *out_refs,
                alpha, power, class_num, emit_all):
    """One batch tile of the AMU forward.

    cf_ref   : (TB, Dcp) f32       clip features (feature dim zero-padded)
    af_ref   : (TB, Dap) f32       aux features
    wclip_ref: (Dcp, Cp) bf16/f32  100 * clip_weights (resident)
    wadpt_ref: (Dap, Cp) bf16/f32  adapter W^T (resident)
    out_refs : logits [, clip_logits, aux_logits], each (TB, Cp) f32
    """
    cf = cf_ref[...].astype(jnp.float32)
    af = af_ref[...].astype(jnp.float32)

    # L2 normalize along the feature dim; rsqrt -> EUP slot (no vdiv/vsqrt chain).
    # Padded feature columns are zero, so the sums are already over the true dims.
    cf = cf * lax.rsqrt(jnp.sum(cf * cf, axis=-1, keepdims=True))
    af = af * lax.rsqrt(jnp.sum(af * af, axis=-1, keepdims=True))

    wdt = wclip_ref.dtype
    # 100x scale already folded into wclip by the wrapper.
    clip_logits = jnp.dot(cf.astype(wdt), wclip_ref[...],
                          preferred_element_type=jnp.float32)
    aux_logits = jnp.dot(af.astype(wdt), wadpt_ref[...],
                         preferred_element_type=jnp.float32)

    c = class_num
    cp = clip_logits.shape[1]
    mask = None
    if cp != c:
        mask = lax.broadcasted_iota(jnp.int32, clip_logits.shape, 1) < c

    # ---- logit_normalize (torch.std is unbiased, ddof=1) over the true C classes.
    # Padded columns of aux_logits are exactly 0 (zero weight columns), so the plain
    # sum already equals the sum over valid classes; only the variance needs a mask.
    mu = jnp.sum(aux_logits, axis=1, keepdims=True) * jnp.float32(1.0 / c)
    diff = aux_logits - mu
    sq = diff * diff
    if mask is not None:
        sq = jnp.where(mask, sq, 0.0)
    var = jnp.sum(sq, axis=1, keepdims=True) * jnp.float32(1.0 / (c - 1))
    aux_norm = diff * lax.rsqrt(var)

    # ---- uncertainty('entropy'): softmax -> normalized entropy -> exp(ent*power).
    # log p = (s - m) - log(sum_e); the log2 factors cancel against log2(C), so we
    # only need one (B,C) exp, one per-row log, and a compile-time 1/ln(C) scale.
    # entropy(nats) = log(sum_e) - sum(e*sm)/sum_e   (per-row division only).
    s = clip_logits
    if mask is not None:
        s = jnp.where(mask, s, jnp.float32(-1e30))
    m = jnp.max(s, axis=-1, keepdims=True)
    sm = s - m
    e = jnp.exp(sm)
    sum_e = jnp.sum(e, axis=-1, keepdims=True)
    sum_esm = jnp.sum(e * sm, axis=-1, keepdims=True)
    ent_nats = jnp.log(sum_e) - sum_esm * pl.reciprocal(sum_e, approx=True)
    factor = jnp.exp(ent_nats * jnp.float32(power / math.log(c)))

    # ---- merge ----
    if alpha == 1.0:
        logits = clip_logits + factor * aux_norm
    else:
        logits = clip_logits + (jnp.float32(alpha) * factor) * aux_norm

    out_refs[0][...] = logits.astype(out_refs[0].dtype)
    if emit_all:
        out_refs[1][...] = clip_logits.astype(out_refs[1].dtype)
        out_refs[2][...] = aux_norm.astype(out_refs[2].dtype)


def amu_forward(clip_features, aux_features, clip_weights, adapter_weight,
                *, alpha=ALPHA, power=UNCENT_POWER, return_all=True,
                use_bf16_matmul=True, batch_tile=512):
    """AMU_Model.forward with precomputed features (images=None, labels=None)."""
    B, Dc = clip_features.shape
    Ba, Da = aux_features.shape
    assert Ba == B
    C = clip_weights.shape[1]

    # ---- lane-dense padding: classes & feature dims up to multiples of 128 ----
    Cp = _round_up(C, 128)
    Dcp = _round_up(Dc, 128)
    Dap = _round_up(Da, 128)

    # ---- batch tile: multiple of 8, clamped so the per-step footprint stays well
    # under the default scoped VMEM limit (v7x: 64 MiB VMEM, 32 MiB scoped default).
    n_out = 3 if return_all else 1
    TB = min(int(batch_tile), _round_up(B, 8))
    TB = max(8, (TB // 8) * 8)
    w_bytes = (Dcp + Dap) * Cp * (2 if use_bf16_matmul else 4)

    def footprint(tb):  # resident weights + 2x double-buffered input/output tiles
        return w_bytes + 2 * tb * ((Dcp + Dap) * 4 + n_out * Cp * 4)

    while TB > 8 and footprint(TB) > 24 * 1024 * 1024:
        TB = max(8, (TB // 2) // 8 * 8)
    Bp = _round_up(B, TB)

    def pad2(x, r, c):
        return x if x.shape == (r, c) else jnp.pad(
            x, ((0, r - x.shape[0]), (0, c - x.shape[1])))

    w_dtype = jnp.bfloat16 if use_bf16_matmul else jnp.float32
    cf_p = pad2(clip_features.astype(jnp.float32), Bp, Dcp)
    af_p = pad2(aux_features.astype(jnp.float32), Bp, Dap)
    # glue: fold the 100x logit scale into the resident clip weight once, and
    # pre-transpose the nn.Linear weight (C, Da) -> (Da, C).
    wclip_p = pad2((100.0 * clip_weights).astype(jnp.float32), Dcp, Cp).astype(w_dtype)
    wadpt_p = pad2(adapter_weight.T.astype(jnp.float32), Dap, Cp).astype(w_dtype)

    kernel = functools.partial(_amu_kernel, alpha=float(alpha), power=float(power),
                               class_num=int(C), emit_all=bool(return_all))

    grid = (Bp // TB,)
    in_specs = [
        pl.BlockSpec((TB, Dcp), lambda i: (i, 0)),
        pl.BlockSpec((TB, Dap), lambda i: (i, 0)),
        pl.BlockSpec((Dcp, Cp), lambda i: (0, 0)),   # resident weight block
        pl.BlockSpec((Dap, Cp), lambda i: (0, 0)),   # resident weight block
    ]
    out_shapes = tuple(jax.ShapeDtypeStruct((Bp, Cp), jnp.float32)
                       for _ in range(n_out))
    out_specs = tuple(pl.BlockSpec((TB, Cp), lambda i: (i, 0))
                      for _ in range(n_out))

    bytes_per_w = 2 if use_bf16_matmul else 4
    cost = pl.CostEstimate(
        flops=2 * B * (Dc + Da) * C,
        transcendentals=2 * B * C,
        bytes_accessed=(B * (Dc + Da) * 4 + (Dc + Da) * C * bytes_per_w
                        + n_out * B * C * 4),
    )

    outs = pl.pallas_call(
        kernel,
        grid=grid,
        in_specs=in_specs,
        out_specs=out_specs,
        out_shape=out_shapes,
        compiler_params=pltpu.CompilerParams(dimension_semantics=("parallel",)),
        cost_estimate=cost,
    )(cf_p, af_p, wclip_p, wadpt_p)

    logits = outs[0][:B, :C]
    clip_logits = outs[1][:B, :C] if return_all else None
    aux_logits = outs[2][:B, :C] if return_all else None
    return {
        "logits": logits,
        "clip_logits": clip_logits,
        "aux_logits": aux_logits,
        "loss": None,
        "loss_merge": None,
        "loss_aux": None,
    }


def _reference(clip_features, aux_features, clip_weights, adapter_weight,
               *, alpha=ALPHA, power=UNCENT_POWER, use_bf16_matmul=True):
    """Pure-JAX reference (same bf16 matmul-operand rounding as the kernel)."""
    cf = clip_features / jnp.linalg.norm(clip_features, axis=-1, keepdims=True)
    af = aux_features / jnp.linalg.norm(aux_features, axis=-1, keepdims=True)
    wclip = 100.0 * clip_weights
    wadpt = adapter_weight.T
    if use_bf16_matmul:
        cf = cf.astype(jnp.bfloat16).astype(jnp.float32)
        af = af.astype(jnp.bfloat16).astype(jnp.float32)
        wclip = wclip.astype(jnp.bfloat16).astype(jnp.float32)
        wadpt = wadpt.astype(jnp.bfloat16).astype(jnp.float32)
    clip_logits = cf @ wclip
    aux_logits = af @ wadpt
    mu = jnp.mean(aux_logits, axis=1, keepdims=True)
    sd = jnp.std(aux_logits, axis=1, keepdims=True, ddof=1)
    aux_logits = (aux_logits - mu) / sd
    logp = jax.nn.log_softmax(clip_logits, axis=-1)
    p = jnp.exp(logp)
    ent = -jnp.sum(p * logp, axis=-1, keepdims=True) / jnp.log(
        jnp.float32(clip_logits.shape[-1]))
    factor = jnp.exp(ent * power)
    logits = clip_logits + factor * aux_logits * alpha
    return logits, clip_logits, aux_logits


if __name__ == "__main__":
    key = jax.random.PRNGKey(0)
    B, Dc, Da, C = 16, 32, 32, 16  # batch, clip feat dim, aux feat dim, classes

    k1, k2, k3, k4 = jax.random.split(key, 4)
    clip_features = jax.random.normal(k1, (B, Dc), dtype=jnp.float32)
    aux_features = jax.random.normal(k2, (B, Da), dtype=jnp.float32)
    # clip_weights: (feat_dim, class_num), L2-normalized text embeddings in practice
    clip_weights = jax.random.normal(k3, (Dc, C), dtype=jnp.float32)
    clip_weights = clip_weights / jnp.linalg.norm(clip_weights, axis=0, keepdims=True)
    # Linear_Adapter fc.weight: (class_num, feat_dim), random init
    adapter_weight = 0.02 * jax.random.normal(k4, (C, Da), dtype=jnp.float32)

    # batch_tile=8 -> grid=(2,) so the batch pipeline / padding paths are exercised.
    out = amu_forward(clip_features, aux_features, clip_weights, adapter_weight,
                      return_all=True, use_bf16_matmul=True, batch_tile=8)
    jax.block_until_ready(out["logits"])

    ref_logits, ref_clip, ref_aux = _reference(
        clip_features, aux_features, clip_weights, adapter_weight,
        alpha=ALPHA, power=UNCENT_POWER, use_bf16_matmul=True)

    assert jnp.allclose(out["clip_logits"], ref_clip, atol=1e-2, rtol=1e-2), (
        float(jnp.max(jnp.abs(out["clip_logits"] - ref_clip))))
    assert jnp.allclose(out["aux_logits"], ref_aux, atol=1e-2, rtol=1e-2), (
        float(jnp.max(jnp.abs(out["aux_logits"] - ref_aux))))
    assert jnp.allclose(out["logits"], ref_logits, atol=1e-2, rtol=1e-2), (
        float(jnp.max(jnp.abs(out["logits"] - ref_logits))))

    # Also run the lean inference path (logits only, 1/3 of the HBM writeback).
    out_lean = amu_forward(clip_features, aux_features, clip_weights, adapter_weight,
                           return_all=False, use_bf16_matmul=True, batch_tile=8)
    jax.block_until_ready(out_lean["logits"])
    assert jnp.allclose(out_lean["logits"], ref_logits, atol=1e-2, rtol=1e-2)

    print("KERNEL_OK")
</pallas_src>

<mosaic_0001>
module attributes {stable_mosaic.version = 11 : i64} {
  func.func @_amu_kernel(%arg0: i32, %arg1: memref<8x128xf32, #tpu.memory_space<vmem>>, %arg2: memref<8x128xf32, #tpu.memory_space<vmem>>, %arg3: memref<128x128xbf16, #tpu.memory_space<vmem>>, %arg4: memref<128x128xbf16, #tpu.memory_space<vmem>>, %arg5: memref<8x128xf32, #tpu.memory_space<vmem>>, %arg6: memref<8x128xf32, #tpu.memory_space<vmem>>, %arg7: memref<8x128xf32, #tpu.memory_space<vmem>>) attributes {dimension_semantics = [#tpu.dimension_semantics<parallel>], iteration_bounds = array<i64: 2>, scalar_prefetch = 0 : i64, scratch_operands = 0 : i64, tpu.core_type = #tpu.core_type<tc>, window_params = [{transform_indices = @transform_0, window_bounds = array<i64: 8, 128>}, {transform_indices = @transform_1, window_bounds = array<i64: 8, 128>}, {pipeline_mode = #tpu.pipeline_mode<synchronous>, transform_indices = @transform_2, window_bounds = array<i64: 128, 128>}, {pipeline_mode = #tpu.pipeline_mode<synchronous>, transform_indices = @transform_3, window_bounds = array<i64: 128, 128>}, {transform_indices = @transform_4, window_bounds = array<i64: 8, 128>}, {transform_indices = @transform_5, window_bounds = array<i64: 8, 128>}, {transform_indices = @transform_6, window_bounds = array<i64: 8, 128>}]} {
    %c0 = arith.constant 0 : index
    %c0_0 = arith.constant 0 : index
    %0 = vector.load %arg1[%c0, %c0_0] : memref<8x128xf32, #tpu.memory_space<vmem>>, vector<8x128xf32>
    %c0_1 = arith.constant 0 : index
    %c0_2 = arith.constant 0 : index
    %1 = vector.load %arg2[%c0_1, %c0_2] : memref<8x128xf32, #tpu.memory_space<vmem>>, vector<8x128xf32>
    %2 = arith.mulf %0, %0 : vector<8x128xf32>
    %cst = arith.constant dense<0.000000e+00> : vector<8xf32>
    %3 = vector.multi_reduction <add>, %2, %cst [1] : vector<8x128xf32> to vector<8xf32>
    %4 = vector.shape_cast %3 : vector<8xf32> to vector<8x1xf32>
    %5 = math.rsqrt %4 : vector<8x1xf32>
    %6 = vector.broadcast %5 : vector<8x1xf32> to vector<8x128xf32>
    %7 = arith.mulf %0, %6 : vector<8x128xf32>
    %8 = arith.mulf %1, %1 : vector<8x128xf32>
    %cst_3 = arith.constant dense<0.000000e+00> : vector<8xf32>
    %9 = vector.multi_reduction <add>, %8, %cst_3 [1] : vector<8x128xf32> to vector<8xf32>
    %10 = vector.shape_cast %9 : vector<8xf32> to vector<8x1xf32>
    %11 = math.rsqrt %10 : vector<8x1xf32>
    %12 = vector.broadcast %11 : vector<8x1xf32> to vector<8x128xf32>
    %13 = arith.mulf %1, %12 : vector<8x128xf32>
    %14 = arith.truncf %7 : vector<8x128xf32> to vector<8x128xbf16>
    %c0_4 = arith.constant 0 : index
    %c0_5 = arith.constant 0 : index
    %15 = vector.load %arg3[%c0_4, %c0_5] : memref<128x128xbf16, #tpu.memory_space<vmem>>, vector<128x128xbf16>
    %cst_6 = arith.constant dense<0.000000e+00> : vector<8x128xf32>
    %16 = tpu.matmul %14, %15, %cst_6 {dimension_numbers = #tpu.dot_dimension_numbers<[1], [0], [0], [1], [0, 0, 1, 1], [], []>} : vector<8x128xbf16>, vector<128x128xbf16>, vector<8x128xf32> -> vector<8x128xf32>
    %17 = arith.truncf %13 : vector<8x128xf32> to vector<8x128xbf16>
    %c0_7 = arith.constant 0 : index
    %c0_8 = arith.constant 0 : index
    %18 = vector.load %arg4[%c0_7, %c0_8] : memref<128x128xbf16, #tpu.memory_space<vmem>>, vector<128x128xbf16>
    %cst_9 = arith.constant dense<0.000000e+00> : vector<8x128xf32>
    %19 = tpu.matmul %17, %18, %cst_9 {dimension_numbers = #tpu.dot_dimension_numbers<[1], [0], [0], [1], [0, 0, 1, 1], [], []>} : vector<8x128xbf16>, vector<128x128xbf16>, vector<8x128xf32> -> vector<8x128xf32>
    %20 = tpu.iota {dimensions = array<i32: 1>} : vector<8x128xi32>
    %c16_i32 = arith.constant 16 : i32
    %21 = vector.broadcast %c16_i32 : i32 to vector<8x128xi32>
    %22 = arith.cmpi slt, %20, %21 : vector<8x128xi32>
    %cst_10 = arith.constant dense<0.000000e+00> : vector<8xf32>
    %23 = vector.multi_reduction <add>, %19, %cst_10 [1] : vector<8x128xf32> to vector<8xf32>
    %24 = vector.shape_cast %23 : vector<8xf32> to vector<8x1xf32>
    %cst_11 = arith.constant 6.250000e-02 : f32
    %25 = vector.broadcast %cst_11 : f32 to vector<8x1xf32>
    %26 = arith.mulf %24, %25 : vector<8x1xf32>
    %27 = vector.broadcast %26 : vector<8x1xf32> to vector<8x128xf32>
    %28 = arith.subf %19, %27 : vector<8x128xf32>
    %29 = arith.mulf %28, %28 : vector<8x128xf32>
    %cst_12 = arith.constant 0.000000e+00 : f32
    %30 = vector.broadcast %cst_12 : f32 to vector<8x128xf32>
    %31 = arith.select %22, %29, %30 : vector<8x128xi1>, vector<8x128xf32>
    %cst_13 = arith.constant dense<0.000000e+00> : vector<8xf32>
    %32 = vector.multi_reduction <add>, %31, %cst_13 [1] : vector<8x128xf32> to vector<8xf32>
    %33 = vector.shape_cast %32 : vector<8xf32> to vector<8x1xf32>
    %cst_14 = arith.constant 0.0666666701 : f32
    %34 = vector.broadcast %cst_14 : f32 to vector<8x1xf32>
    %35 = arith.mulf %33, %34 : vector<8x1xf32>
    %36 = math.rsqrt %35 : vector<8x1xf32>
    %37 = vector.broadcast %36 : vector<8x1xf32> to vector<8x128xf32>
    %38 = arith.mulf %28, %37 : vector<8x128xf32>
    %cst_15 = arith.constant -1.000000e+30 : f32
    %39 = vector.broadcast %cst_15 : f32 to vector<8x128xf32>
    %40 = arith.select %22, %16, %39 : vector<8x128xi1>, vector<8x128xf32>
    %cst_16 = arith.constant dense<0xFF800000> : vector<8xf32>
    %41 = vector.multi_reduction <maximumf>, %40, %cst_16 [1] : vector<8x128xf32> to vector<8xf32>
    %42 = vector.shape_cast %41 : vector<8xf32> to vector<8x1xf32>
    %43 = vector.broadcast %42 : vector<8x1xf32> to vector<8x128xf32>
    %44 = arith.subf %40, %43 : vector<8x128xf32>
    %45 = math.exp %44 : vector<8x128xf32>
    %cst_17 = arith.constant dense<0.000000e+00> : vector<8xf32>
    %46 = vector.multi_reduction <add>, %45, %cst_17 [1] : vector<8x128xf32> to vector<8xf32>
    %47 = vector.shape_cast %46 : vector<8xf32> to vector<8x1xf32>
    %48 = arith.mulf %45, %44 : vector<8x128xf32>
    %cst_18 = arith.constant dense<0.000000e+00> : vector<8xf32>
    %49 = vector.multi_reduction <add>, %48, %cst_18 [1] : vector<8x128xf32> to vector<8xf32>
    %50 = vector.shape_cast %49 : vector<8xf32> to vector<8x1xf32>
    %51 = math.log %47 : vector<8x1xf32>
    %52 = tpu.reciprocal %47 {approx = true} : vector<8x1xf32> -> vector<8x1xf32>
    %53 = arith.mulf %50, %52 : vector<8x1xf32>
    %54 = arith.subf %51, %53 : vector<8x1xf32>
    %cst_19 = arith.constant 0.180336878 : f32
    %55 = vector.broadcast %cst_19 : f32 to vector<8x1xf32>
    %56 = arith.mulf %54, %55 : vector<8x1xf32>
    %57 = math.exp %56 : vector<8x1xf32>
    %58 = vector.broadcast %57 : vector<8x1xf32> to vector<8x128xf32>
    %59 = arith.mulf %58, %38 : vector<8x128xf32>
    %60 = arith.addf %16, %59 : vector<8x128xf32>
    %c0_20 = arith.constant 0 : index
    %c0_21 = arith.constant 0 : index
    %61 = vector.load %arg5[%c0_20, %c0_21] : memref<8x128xf32, #tpu.memory_space<vmem>>, vector<8x128xf32>
    tpu.vector_store %arg5[%c0_20, %c0_21], %60 {strides = array<i32>} : memref<8x128xf32, #tpu.memory_space<vmem>>, vector<8x128xf32>,
    %c0_22 = arith.constant 0 : index
    %c0_23 = arith.constant 0 : index
    %62 = vector.load %arg6[%c0_22, %c0_23] : memref<8x128xf32, #tpu.memory_space<vmem>>, vector<8x128xf32>
    tpu.vector_store %arg6[%c0_22, %c0_23], %16 {strides = array<i32>} : memref<8x128xf32, #tpu.memory_space<vmem>>, vector<8x128xf32>,
    %c0_24 = arith.constant 0 : index
    %c0_25 = arith.constant 0 : index
    %63 = vector.load %arg7[%c0_24, %c0_25] : memref<8x128xf32, #tpu.memory_space<vmem>>, vector<8x128xf32>
    tpu.vector_store %arg7[%c0_24, %c0_25], %38 {strides = array<i32>} : memref<8x128xf32, #tpu.memory_space<vmem>>, vector<8x128xf32>,
    return
  }
  func.func @transform_0(%arg0: i32) -> (i32, i32) {
    %c0_i32 = arith.constant 0 : i32
    %c0_i32_0 = arith.constant 0 : i32
    return %arg0, %c0_i32 : i32, i32
  }
  func.func @transform_1(%arg0: i32) -> (i32, i32) {
    %c0_i32 = arith.constant 0 : i32
    %c0_i32_0 = arith.constant 0 : i32
    return %arg0, %c0_i32 : i32, i32
  }
  func.func @transform_2(%arg0: i32) -> (i32, i32) {
    %c0_i32 = arith.constant 0 : i32
    %c0_i32_0 = arith.constant 0 : i32
    %c0_i32_1 = arith.constant 0 : i32
    return %c0_i32, %c0_i32_0 : i32, i32
  }
  func.func @transform_3(%arg0: i32) -> (i32, i32) {
    %c0_i32 = arith.constant 0 : i32
    %c0_i32_0 = arith.constant 0 : i32
    %c0_i32_1 = arith.constant 0 : i32
    return %c0_i32, %c0_i32_0 : i32, i32
  }
  func.func @transform_4(%arg0: i32) -> (i32, i32) {
    %c0_i32 = arith.constant 0 : i32
    %c0_i32_0 = arith.constant 0 : i32
    return %arg0, %c0_i32 : i32, i32
  }
  func.func @transform_5(%arg0: i32) -> (i32, i32) {
    %c0_i32 = arith.constant 0 : i32
    %c0_i32_0 = arith.constant 0 : i32
    return %arg0, %c0_i32 : i32, i32
  }
  func.func @transform_6(%arg0: i32) -> (i32, i32) {
    %c0_i32 = arith.constant 0 : i32
    %c0_i32_0 = arith.constant 0 : i32
    return %arg0, %c0_i32 : i32, i32
  }
}

</mosaic_0001>

<bundles_post_ra>
// kernel: tpu_custom_call.1
= control target key start
LH: loop header
LB: loop body
LE: loop exit
PB: predicated region body
PF: predicated region fallthrough
CT: control target
= control target key end

     0   :  { %s1707_s0 = inlined_call_operand.hbm [shape: f32[16,128], index: 0, kind: input, shape index: {}]   ;;  %s1708_s1 = inlined_call_operand.hbm [shape: f32[16,128], index: 1, kind: input, shape index: {}]   ;;  %s1709_s2 = inlined_call_operand.hbm [shape: bf16[128,128], index: 2, kind: input, shape index: {}]   ;;  %s1710_s3 = inlined_call_operand.hbm [shape: bf16[128,128], index: 3, kind: input, shape index: {}]   ;;  %s1711_s4 = inlined_call_operand.hbm [shape: f32[16,128], index: 4, kind: output, shape index: {0}]   ;;  %s1712_s5 = inlined_call_operand.hbm [shape: f32[16,128], index: 5, kind: output, shape index: {1}]   ;;  %s1713_s6 = inlined_call_operand.hbm [shape: f32[16,128], index: 6, kind: output, shape index: {2}]  }
   0x1   :  { %1719 = sst [smem:[#allocation21_spill]] %s1709_s2 }
   0x2   :  { %1720 = sst [smem:[#allocation22_spill]] %s1710_s3 }
   0x3   :  { %12 = vsyncpa [#allocation3], 0 }
   0x4   :  { %14 = vsyncpa [#allocation3 + $0x1], 0 }
   0x5   :  { %15 = vsyncpa [#allocation6], 0 }
   0x6   :  { %17 = vsyncpa [#allocation6 + $0x1], 0 }
   0x7   :  { %18 = vsyncpa [#allocation9], 0 }
   0x8   :  { %19 = vsyncpa [#allocation4], 0 }
   0x9   :  { %21 = vsyncpa [#allocation4 + $0x1], 0 }
   0xa   :  { %22 = vsyncpa [#allocation12], 0 }
   0xb   :  { %24 = vsyncpa [#allocation12 + $0x1], 0  ;;  %s1352_s21 = smov 0   ;;  %s1354_s22 = smov 0  }
   0xc   :  { %s1356_s23 = smov 0   ;;  %s1358_s24 = smov 0  }
   0xd LB: > { %s1373_s25 = sadd.s32 4294967295, %s1304_s24   ;;  %s1715_s26 = sadd.s32 4294967294, %s1304_s24   ;;  %s1304_s24 = sphi %s1358_s24, %s1745_s24   ;;  %s1300_s23 = sphi %s1356_s23, %s1744_s23   ;;  %s1296_s22 = sphi %s1354_s22, %s1743_s22   ;;  %s1292_s21 = sphi %s1352_s21, %s1742_s21  }
   0xe   : > { %p50_p0 = scmp.ne.s32.totalorder %s1296_s22, %s1292_s21  ;;  %p1714_p1 = scmp.eq.s32.totalorder %s1373_s25, 0 }
   0xf   : > { %p148_p3 = scmp.eq.s32.totalorder %s1715_s26, 1  ;;  %p836_p5 = scmp.ge.s32.totalorder %s1304_s24, 1 }
  0x10   : > { %p1384_p4 = por %p1714_p1, %p50_p0  ;;  %p207_p7 = scmp.lt.s32.totalorder %s1304_s24, 3 }
  0x11   : > { %p1389_p6 = por %p148_p3, %p50_p0  ;;  %s1306_s30 = smov [#allocation7]  }
  0x12   : > { %s1721_s27 = scalar_select %p1384_p4, 1, 0 }
  0x13   : > { %s1722_s28 = scalar_select %p1389_p6, 1, 0 }
  0x14   : > { %p1394_p8 = pnand %p836_p5, %p207_p7  ;;  %s219_s7 = sshll.u32 %s1306_s30, 4  ;;  %s1398_s7 = int_to_ptr.vmem [resolvable:$true] %s219_s7 }
  0x15   : > { %s1307_s9 = smov [#allocation8]   ;;  %s1725_s2 = sld [smem:[#allocation21_spill]] }
  0x16   : > { %s1723_s29 = scalar_select %p1394_p8, 1, 0 }
  0x17   : > { %p952_p9 = pneg %p1394_p8  ;;  %s232_s10 = sshll.u32 %s1307_s9, 4  ;;  %s1409_s10 = int_to_ptr.vmem [resolvable:$true] %s232_s10 }
  0x19   : > { %p1405_p11 = pnand %p952_p9, %p1714_p1 }
  0x1b   : > { %s1050_s13 = scalar_lea.hbm %s1725_s2, 1024  ;;  %p1052_p13 = pneg %p1405_p11 }
  0x1c   : > { %p1051_p12 = scmp.ne.s32.totalorder %s1725_s2, %s1050_s13  ;;  %p1057_p5 = scmp.lt.u32.totalorder %s1050_s13, %s1725_s2 }
  0x1e   : > { %p1053_p0 = pnand %p1052_p13, %p1051_p12 }
  0x20   : > { %p1054_p3 = pneg %p1053_p0 }
  0x22   : > { %p1059_p7 = pnand %p1057_p5, %p1054_p3 }
  0x24   : > { %1062 = shalt.err (!%p1059_p7)
}
  0x25   : > { %s1063_s18 = scalar_lea.vmem %s1398_s7, 1024  ;;  %p1071_p2 = scmp.lt.s32.totalorder %s1398_s7, %s1398_s7 }
  0x26   : > { %p1064_p9 = scmp.ne.s32.totalorder %s1398_s7, %s1063_s18  ;;  %p1072_p12 = scmp.lt.s32.totalorder %s1063_s18, %s1063_s18 }
  0x28   : > { %p1066_p10 = pnand %p1064_p9, %p1052_p13  ;;  %p1073_p0 = por %p1072_p12, %p1071_p2 }
  0x2a   : > { %p1067_p1 = pneg %p1066_p10 }
  0x2c   : > { %p1074_p6 = pnand %p1073_p0, %p1067_p1 }
  0x2e   : > { %1077 = shalt.err (!%p1074_p6)
}
  0x2f   : > { %s1308_s19 = smov 64   ;;  %s1309_s20 = smov 4  }
  0x30   : > { %955 = dma.hbm_to_vmem [thread:$0]  (!%p1405_p11), %s1725_s2, 1024, %s1398_s7, [#allocation6], %s1308_s19, %s1308_s19, %s1309_s20  }
  0x31   : > { %s1726_s3 = sld [smem:[#allocation22_spill]] }
  0x37   : > { %s1078_s13 = scalar_lea.hbm %s1726_s3, 1024 }
  0x38   : > { %p1079_p2 = scmp.ne.s32.totalorder %s1726_s3, %s1078_s13  ;;  %p1085_p10 = scmp.lt.u32.totalorder %s1078_s13, %s1726_s3 }
  0x3a   : > { %p1081_p1 = pnand %p1079_p2, %p1052_p13 }
  0x3c   : > { %p1082_p6 = pneg %p1081_p1 }
  0x3e   : > { %p1087_p3 = pnand %p1085_p10, %p1082_p6 }
  0x40   : > { %1090 = shalt.err (!%p1087_p3)
}
  0x41   : > { %s1091_s7 = scalar_lea.vmem %s1409_s10, 1024  ;;  %p1099_p12 = scmp.lt.s32.totalorder %s1409_s10, %s1409_s10 }
  0x42   : > { %p1092_p5 = scmp.ne.s32.totalorder %s1409_s10, %s1091_s7  ;;  %p1100_p0 = scmp.lt.s32.totalorder %s1091_s7, %s1091_s7 }
  0x44   : > { %p1094_p7 = pnand %p1092_p5, %p1052_p13  ;;  %p1101_p2 = por %p1100_p0, %p1099_p12 }
  0x46   : > { %p1095_p9 = pneg %p1094_p7 }
  0x48   : > { %p1102_p1 = pnand %p1101_p2, %p1095_p9 }
  0x4a   : > { %1105 = shalt.err (!%p1102_p1)
}
  0x4b   : > { %958 = dma.hbm_to_vmem [thread:$0]  (!%p1405_p11), %s1726_s3, 1024, %s1409_s10, [#allocation9], %s1308_s19, %s1308_s19, %s1309_s20  }
  0x4c   : > { %s1464_s9 = sadd.s32 1, %s1304_s24   ;;  %s37_s8 = sadd.s32 1, %s1300_s23 }
  0x4d   : > { %s34_s11 = ssub.s32 %s1304_s24, %s1464_s9  ;;  %p44_p13 = scmp.ne.s32.totalorder %s1300_s23, %s1296_s22 }
  0x4e   : > { %p35_p6 = scmp.eq.s32.totalorder %s34_s11, 0  ;;  %p45_p10 = scmp.eq.s32.totalorder %s1304_s24, 0 }
  0x4f   : > { %p1727_p3 = scmp.eq.s32.totalorder %s1373_s25, 1  ;;  %p978_p7 = scmp.lt.s32.totalorder %s1304_s24, 2 }
  0x50   : > { %s1480_s13 = scalar_select %p35_p6, %s1300_s23, %s37_s8  }
  0x51   : > { %p1474_p5 = por %p1727_p3, %p44_p13  ;;  %p46_p9 = por %p45_p10, %p44_p13 }
  0x52   : > { %1729 = sst [smem:[#allocation20_spill]] %s1480_s13  ;;  %s246_s14 = sand.u32 1, %s1300_s23  }
  0x53   : > { %s1728_s12 = scalar_select %p1474_p5, 1, 0 }
  0x54   : > { %s1483_s10 = sshll.u32 %s246_s14, 3  ;;  %s841_s19 = sshll.u32 %s1304_s24, 7 }
  0x55   : > { %s1489_s16 = scalar_lea.hbm %s1707_s0, %s841_s19  ;;  %s250_s17 = scalar_lea.vmem [#allocation2], %s1483_s10 }
  0x56   : > { %s257_s7 = sshll.u32 %s250_s17, 4  ;;  %p1494_p11 = pnand %p978_p7, %p46_p9  ;;  %s1492_s7 = int_to_ptr.vmem [resolvable:$true] %s257_s7 }
  0x57   : > { %s1501_s11 = scalar_lea.hbm %s1708_s1, %s841_s19  ;;  %s264_s20 = sand.u32 1, %s1304_s24  }
  0x58   : > { %s247_s15 = scalar_lea.sflag [#allocation3], %s246_s14  ;;  %s1106_s26 = scalar_lea.hbm %s1489_s16, 128 }
  0x59   : > { %p1107_p12 = scmp.ne.s32.totalorder %s1489_s16, %s1106_s26  ;;  %p1108_p0 = pneg %p1494_p11 }
  0x5a   : > { %s1111_s3 = scalar_lea.hbm %s1707_s0, 256  ;;  %p1112_p13 = scmp.lt.u32.totalorder %s1489_s16, %s1707_s0 }
  0x5b   : > { %p1109_p2 = pnand %p1108_p0, %p1107_p12  ;;  %p1113_p6 = scmp.lt.u32.totalorder %s1111_s3, %s1106_s26 }
  0x5c   : > { %p1115_p3 = scmp.lt.u32.totalorder %s1106_s26, %s1489_s16 }
  0x5d   : > { %p1110_p1 = pneg %p1109_p2  ;;  %p1114_p10 = por %p1113_p6, %p1112_p13 }
  0x5f   : > { %p1116_p7 = por %p1115_p3, %p1114_p10 }
  0x61   : > { %p1117_p9 = pnand %p1116_p7, %p1110_p1 }
  0x63   : > { %1120 = shalt.err (!%p1117_p9)
}
  0x64   : > { %s1121_s14 = scalar_lea.vmem %s1492_s7, 128  ;;  %s1310_s2 = smov [#allocation2]  }
  0x65   : > { %p1122_p12 = scmp.ne.s32.totalorder %s1492_s7, %s1121_s14  ;;  %s1126_s19 = sshll.u32 %s1310_s2, 4  ;;  %s1127_s19 = int_to_ptr.vmem [resolvable:$false] %s1126_s19 }
  0x66   : > { %s1128_s13 = scalar_lea.vmem %s1127_s19, 256  ;;  %p1129_p4 = scmp.lt.s32.totalorder %s1492_s7, %s1127_s19 }
  0x67   : > { %p1124_p2 = pnand %p1122_p12, %p1108_p0  ;;  %p1130_p13 = scmp.lt.s32.totalorder %s1128_s13, %s1121_s14 }
  0x69   : > { %p1125_p5 = pneg %p1124_p2  ;;  %p1131_p6 = por %p1130_p13, %p1129_p4 }
  0x6b   : > { %p1132_p10 = pnand %p1131_p6, %p1125_p5 }
  0x6d   : > { %1135 = shalt.err (!%p1132_p10)
}
  0x6e   : > { %962 = dma.hbm_to_vmem [thread:$0]  (!%p1494_p11), %s1489_s16, 128, %s1492_s7, %s247_s15  }
  0x6f   : > { %s268_s3 = scalar_lea.vmem [#allocation5], %s1483_s10  ;;  %s265_s8 = scalar_lea.sflag [#allocation6], %s264_s20 }
  0x70   : > { %s275_s26 = sshll.u32 %s268_s3, 4  ;;  %s1136_s17 = scalar_lea.hbm %s1501_s11, 128  ;;  %s276_s26 = int_to_ptr.vmem [resolvable:$true] %s275_s26 }
  0x71   : > { %p1137_p4 = scmp.ne.s32.totalorder %s1501_s11, %s1136_s17  ;;  %s1141_s2 = scalar_lea.hbm %s1708_s1, 256 }
  0x72   : > { %p1142_p3 = scmp.lt.u32.totalorder %s1501_s11, %s1708_s1  ;;  %p1143_p7 = scmp.lt.u32.totalorder %s1141_s2, %s1136_s17 }
  0x73   : > { %p1139_p5 = pnand %p1137_p4, %p1108_p0  ;;  %p1145_p12 = scmp.lt.u32.totalorder %s1136_s17, %s1501_s11 }
  0x74   : > { %p1144_p9 = por %p1143_p7, %p1142_p3 }
  0x75   : > { %p1140_p1 = pneg %p1139_p5 }
  0x76   : > { %p1146_p2 = por %p1145_p12, %p1144_p9 }
  0x78   : > { %p1147_p13 = pnand %p1146_p2, %p1140_p1 }
  0x7a   : > { %1150 = shalt.err (!%p1147_p13)
}
  0x7b   : > { %s1151_s10 = scalar_lea.vmem %s276_s26, 128  ;;  %s1311_s16 = smov [#allocation5]  }
  0x7c   : > { %p1152_p6 = scmp.ne.s32.totalorder %s276_s26, %s1151_s10  ;;  %s1156_s7 = sshll.u32 %s1311_s16, 4  ;;  %s1157_s7 = int_to_ptr.vmem [resolvable:$false] %s1156_s7 }
  0x7d   : > { %s1158_s20 = scalar_lea.vmem %s1157_s7, 256  ;;  %p1159_p5 = scmp.lt.s32.totalorder %s276_s26, %s1157_s7 }
  0x7e   : > { %p1154_p10 = pnand %p1152_p6, %p1108_p0  ;;  %p1160_p8 = scmp.lt.s32.totalorder %s1158_s20, %s1151_s10 }
  0x80   : > { %p1155_p4 = pneg %p1154_p10  ;;  %p1161_p3 = por %p1160_p8, %p1159_p5 }
  0x82   : > { %p1162_p7 = pnand %p1161_p3, %p1155_p4 }
  0x84   : > { %1165 = shalt.err (!%p1162_p7)
}
  0x85   : > { %965 = dma.hbm_to_vmem [thread:$0]  (!%p1494_p11), %s1501_s11, 128, %s276_s26, %s265_s8  }
  0x86   : > { %p1731_p1 = scmp.ne.s32.totalorder %s1723_s29, 0 }
  0x87   : > { %s1554_s15 = sand.u32 (!%p1731_p1), 1, %s1296_s22   ;;  %p1732_p8 = scmp.ne.s32.totalorder (!%p1731_p1), %s1721_s27, 0 }
  0x88   : > { %284 = sbr.rel (%p1731_p1) target bundleno = 884 (0x374), region = 36  ;;  %s1557_s3 = sshll.u32 (!%p1731_p1), %s1554_s15, 3 }
  0x89   : > { %s287_s17 = scalar_lea.sflag (!%p1731_p1), [#allocation3], %s1554_s15  ;;  %s290_s30 = scalar_lea.vmem (!%p1731_p1), [#allocation2], %s1557_s3 }
  0x8f   : > { %1267 = dma.done.wait (%p1732_p8), %s287_s17, 128  }
  0x90   : > { %1269 = vsyncadd (%p1732_p8), %s287_s17, 4294967168  ;;  %s295_s29 = sand.u32 1, %s1373_s25   ;;  %s299_s11 = scalar_lea.vmem [#allocation5], %s1557_s3 }
  0x91   : > { %s296_s18 = scalar_lea.sflag [#allocation6], %s295_s29 }
  0x92   : > { %1271 = dma.done.wait (%p1732_p8), %s296_s18, 128  }
  0x93   : > { %1273 = vsyncadd (%p1732_p8), %s296_s18, 4294967168  ;;  %p1733_p11 = scmp.eq.s32.totalorder %s1373_s25, 0 }
  0x95   : > { %1275 = dma.done.wait (%p1733_p11), [#allocation6], 1024   ;;  %p1734_p0 = pmov %p1733_p11 }
  0x97   : > { %1277 = vsyncadd (%p1734_p0), [#allocation6], 4294966272  ;;  %p1735_p9 = pmov %p1734_p0 }
  0x98   : > { %p1736_p12 = pmov %p1734_p0 }
  0x99   : > { %1279 = dma.done.wait (%p1735_p9), [#allocation9], 1024  }
  0x9a   : > { %1281 = vsyncadd (%p1736_p12), [#allocation9], 4294966272  ;;  %v1312_v0 = vmov 0.0   ;;  %v352_v1 = vld [vmem:[%s290_s30] sm:$0xff]  ;;  %v1581_v2 = vld [vmem:[%s299_s11] sm:$0xff]  ;;  %vm1313_vm0 = vmmov 0   ;;  %v574_v29 = vlaneseq }
  0x9b   : > { %894 = vmatprep.subr.bf16.mxu0 %v1312_v0  ;;  %914 = vmatprep.subr.bf16.mxu1 %v1312_v0  ;;  %v354_v3 = vmul.f32 %v352_v1, %v352_v1  ;;  %v1020_v4 = vld [vmem:[#allocation7] sm:$0xff]   ;;  %v1021_v5 = vld [vmem:[#allocation7 + $0x8] sm:$0xff]   ;;  %v359_v6 = vmul.f32 %v1581_v2, %v1581_v2  ;;  %v1023_v9 = vld [vmem:[#allocation7 + $0x10] sm:$0xff]   ;;  %s343_s27 = scalar_lea.vmem [#allocation11], %s1557_s3  ;;  %s1594_s26 = sshll.u32 %s1373_s25, 7 }
  0x9c   : > { %895 = vmatpush3.bf16.msra.mxu0 %v1020_v4  ;;  %v1022_v7 = vld [vmem:[#allocation8] sm:$0xff]   ;;  %v1024_v8 = vld [vmem:[#allocation8 + $0x8] sm:$0xff]   ;;  %v1026_v10 = vld [vmem:[#allocation8 + $0x10] sm:$0xff]   ;;  %910 = vmatprep.mubr.msk.bf16.mxu0 %vm1313_vm0, %v1312_v0  ;;  %v575_v30 = vand.u32 127, %v574_v29  ;;  %s1600_s2 = scalar_lea.hbm %s1712_s5, %s1594_s26  ;;  %s649_s19 = sshll.u32 %s343_s27, 4  ;;  %s650_s19 = int_to_ptr.vmem [resolvable:$true] %s649_s19 }
  0x9d   : > { %355 = vadd.xlane.f32.xlu0 %v354_v3  ;;  %896 = vmatprep.subr.bf16.mxu0 %v1312_v0  ;;  %v1025_v11 = vld [vmem:[#allocation7 + $0x18] sm:$0xff]   ;;  %v1027_v12 = vld [vmem:[#allocation7 + $0x20] sm:$0xff]   ;;  %v1029_v14 = vld [vmem:[#allocation7 + $0x28] sm:$0xff]   ;;  %s1604_s13 = scalar_lea.sflag [#allocation12], %s295_s29  ;;  %s1166_s10 = scalar_lea.vmem %s650_s19, 128 }
  0x9e   : > { %915 = vmatpush3.bf16.msra.mxu1 %v1022_v7  ;;  %v1028_v13 = vld [vmem:[#allocation8 + $0x18] sm:$0xff]   ;;  %v1030_v15 = vld [vmem:[#allocation8 + $0x20] sm:$0xff]   ;;  %v1032_v16 = vld [vmem:[#allocation8 + $0x28] sm:$0xff]   ;;  %930 = vmatprep.mubr.msk.bf16.mxu1 %vm1313_vm0, %v1312_v0  ;;  %vm576_vm1 = vcmp.lt.s32.totalorder %v575_v30, 16  ;;  %p1167_p2 = scmp.ne.s32.totalorder %s650_s19, %s1166_s10  ;;  %p1737_p13 = scmp.ne.s32.totalorder %s1728_s12, 0 }
  0x9f   : > { %916 = vmatprep.subr.bf16.mxu1 %v1312_v0  ;;  %v1031_v17 = vld [vmem:[#allocation7 + $0x30] sm:$0xff]   ;;  %v1033_v19 = vld [vmem:[#allocation7 + $0x38] sm:$0xff]   ;;  %s1314_s16 = smov [#allocation11]  }
  0xa0   : > { %897 = vmatpush3.bf16.msra.mxu0 %v1021_v5  ;;  %v1034_v18 = vld [vmem:[#allocation8 + $0x30] sm:$0xff]   ;;  %v1035_v20 = vld [vmem:[#allocation8 + $0x38] sm:$0xff]   ;;  %p1168_p6 = pnand %p1167_p2, %p1737_p13  ;;  %s1170_s7 = sshll.u32 %s1314_s16, 4  ;;  %s1171_s7 = int_to_ptr.vmem [resolvable:$false] %s1170_s7 }
  0xa1   : > { %360 = vadd.xlane.f32.xlu0 %v359_v6  ;;  %898 = vmatprep.subr.bf16.mxu0 %v1312_v0  ;;  %s1172_s20 = scalar_lea.vmem %s1171_s7, 256  ;;  %p1173_p4 = scmp.lt.s32.totalorder %s650_s19, %s1171_s7 }
  0xa2   : > { %917 = vmatpush3.bf16.msra.mxu1 %v1024_v8  ;;  %p1169_p10 = pneg %p1168_p6  ;;  %p1174_p5 = scmp.lt.s32.totalorder %s1172_s20, %s1166_s10 }
  0xa3   : > { %918 = vmatprep.subr.bf16.mxu1 %v1312_v0 }
  0xa4   : > { %899 = vmatpush3.bf16.msra.mxu0 %v1023_v9  ;;  %p1175_p3 = por %p1174_p5, %p1173_p4 }
  0xa5   : > { %900 = vmatprep.subr.bf16.mxu0 %v1312_v0 }
  0xa6   : > { %919 = vmatpush3.bf16.msra.mxu1 %v1026_v10  ;;  %p1176_p7 = pnand %p1175_p3, %p1169_p10 }
  0xa7   : > { %920 = vmatprep.subr.bf16.mxu1 %v1312_v0 }
  0xa8   : > { %901 = vmatpush3.bf16.msra.mxu0 %v1025_v11 }
  0xa9   : > { %902 = vmatprep.subr.bf16.mxu0 %v1312_v0 }
  0xaa   : > { %921 = vmatpush3.bf16.msra.mxu1 %v1028_v13 }
  0xab   : > { %922 = vmatprep.subr.bf16.mxu1 %v1312_v0 }
  0xac   : > { %903 = vmatpush3.bf16.msra.mxu0 %v1027_v12 }
  0xad   : > { %904 = vmatprep.subr.bf16.mxu0 %v1312_v0 }
  0xae   : > { %923 = vmatpush3.bf16.msra.mxu1 %v1030_v15 }
  0xaf   : > { %924 = vmatprep.subr.bf16.mxu1 %v1312_v0 }
  0xb0   : > { %905 = vmatpush3.bf16.msra.mxu0 %v1029_v14 }
  0xb1   : > { %906 = vmatprep.subr.bf16.mxu0 %v1312_v0 }
  0xb2   : > { %925 = vmatpush3.bf16.msra.mxu1 %v1032_v16 }
  0xb3   : > { %926 = vmatprep.subr.bf16.mxu1 %v1312_v0 }
  0xb4   : > { %907 = vmatpush3.bf16.msra.mxu0 %v1031_v17 }
  0xb5   : > { %908 = vmatprep.subr.bf16.mxu0 %v1312_v0 }
  0xb6   : > { %927 = vmatpush3.bf16.msra.mxu1 %v1034_v18 }
  0xb7   : > { %928 = vmatprep.subr.bf16.mxu1 %v1312_v0 }
  0xb8   : > { %909 = vmatpush3.bf16.msra.mxu0 %v1033_v19 }
  0xba   : > { %929 = vmatpush3.bf16.msra.mxu1 %v1035_v20 }
 0x12a   : > { %v356_v21 = vpop.xlane.xlu0 %355 }
 0x12b   : > { %1036 = vrsqrt.f32 %v356_v21 }
 0x12e   : > { %v361_v22 = vpop.xlane.xlu0 %360 }
 0x12f   : > { %1038 = vrsqrt.f32 %v361_v22 }
 0x135   : > { %v1037_v23 = vpop.eup %1036 }
 0x136   : > { %v358_v24 = vmul.f32 %v1037_v23, %v352_v1 }
 0x138   : > { %v364_v25 = vpack.c.bf16 %v358_v24, %v358_v24 }
 0x139   : > { %v1039_v26 = vpop.eup %1038 }
 0x13a   : > { %911 = vmatmul.mubr.bf16.vlgmr.msra.gmra.mrb[0].mxu0 %v364_v25  ;;  %v363_v27 = vmul.f32 %v1039_v26, %v1581_v2 }
 0x13c   : > { %v469_v28 = vpack.c.bf16 %v363_v27, %v363_v27 }
 0x13e   : > { %931 = vmatmul.mubr.bf16.vlgmr.msra.gmra.mrb[0].mxu1 %v469_v28 }
 0x20d   : > { %v1586_v31 = vpop.f32.mrb[0].mxu0 }
 0x20e   : > { %610 = vst [vmem:[%s343_s27] sm:$0xff] %v1586_v31  ;;  %v912_v32 = vpop.f32.mrb[1].mxu0  ;;  %v588_v33 = vsel %vm576_vm1, %v1586_v31, -1e+30 }
 0x20f   : > { %589 = vmax.xlane.f32.xlu1 %v588_v33  ;;  %v466_v34 = vpop.f32.mrb[2].mxu0 }
 0x210   : > { %v913_v35 = vpop.f32.mrb[3].mxu0 }
 0x211   : > { %v568_v36 = vpop.f32.mrb[0].mxu1 }
 0x212   : > { %v932_v37 = vpop.f32.mrb[1].mxu1 }
 0x213   : > { %577 = vadd.xlane.f32.xlu1 %v568_v36  ;;  %v571_v38 = vpop.f32.mrb[2].mxu1 }
 0x214   : > { %v933_v39 = vpop.f32.mrb[3].mxu1 }
 0x29c   : > { %v590_v40 = vpop.xlane.xlu1 %589 }
 0x29d   : > { %v591_v41 = vsub.f32 %v588_v33, %v590_v40 }
 0x29f   : > { %v592_v42 = vmul.f32 1.442695, %v591_v41 }
 0x2a0   : > { %v578_v43 = vpop.xlane.xlu1 %577 }
 0x2a1   : > { %1040 = vpow2.f32 %v592_v42  ;;  %v579_v44 = vmul.f32 0.0625, %v578_v43 }
 0x2a3   : > { %v580_v45 = vsub.f32 %v568_v36, %v579_v44 }
 0x2a5   : > { %v581_v47 = vmul.f32 %v580_v45, %v580_v45 }
 0x2a7   : > { %v582_v49 = vsel %vm576_vm1, %v581_v47, 0.0 }
 0x2ab   : > { %v1041_v46 = vpop.eup %1040 }
 0x2ac   : > { %594 = vadd.xlane.f32.xlu0 %v1041_v46  ;;  %v596_v48 = vmul.f32 %v1041_v46, %v591_v41 }
 0x2ae   : > { %597 = vadd.xlane.f32.xlu1 %v596_v48 }
 0x2b0   : > { %583 = vadd.xlane.f32.xlu0 %v582_v49 }
 0x2b1   : > { %1179 = shalt.err (!%p1176_p7)
}
 0x2b2   : > { %s1180_s25 = scalar_lea.hbm %s1600_s2, 128  ;;  %s1184_s29 = scalar_lea.hbm %s1712_s5, 256 }
 0x2b3   : > { %p1181_p1 = scmp.ne.s32.totalorder %s1600_s2, %s1180_s25  ;;  %p1185_p0 = scmp.lt.u32.totalorder %s1600_s2, %s1712_s5 }
 0x2b4   : > { %p1186_p9 = scmp.lt.u32.totalorder %s1184_s29, %s1180_s25  ;;  %p1188_p2 = scmp.lt.u32.totalorder %s1180_s25, %s1600_s2 }
 0x2b5   : > { %p1182_p8 = pnand %p1181_p1, %p1737_p13 }
 0x2b6   : > { %p1187_p12 = por %p1186_p9, %p1185_p0 }
 0x2b7   : > { %p1183_p11 = pneg %p1182_p8 }
 0x2b8   : > { %p1189_p6 = por %p1188_p2, %p1187_p12 }
 0x2ba   : > { %p1190_p10 = pnand %p1189_p6, %p1183_p11 }
 0x2bc   : > { %1193 = shalt.err (!%p1190_p10)
}
 0x2bd   : > { %947 = dma.vmem_to_hbm [thread:$0]  (%p1737_p13), %s650_s19, 128, %s1600_s2, %s1604_s13  }
 0x2be   : > { %s350_s27 = scalar_lea.vmem [#allocation13], %s1557_s3  ;;  %s1629_s19 = scalar_lea.hbm %s1713_s6, %s1594_s26 }
 0x2bf   : > { %s662_s8 = sshll.u32 %s350_s27, 4  ;;  %s1315_s16 = smov [#allocation13]   ;;  %s1631_s8 = int_to_ptr.vmem [resolvable:$true] %s662_s8 }
 0x2c0   : > { %s1194_s10 = scalar_lea.vmem %s1631_s8, 128  ;;  %s1198_s7 = sshll.u32 %s1315_s16, 4  ;;  %s1199_s7 = int_to_ptr.vmem [resolvable:$false] %s1198_s7 }
 0x2c1   : > { %p1195_p4 = scmp.ne.s32.totalorder %s1631_s8, %s1194_s10  ;;  %s1200_s20 = scalar_lea.vmem %s1199_s7, 256 }
 0x2c2   : > { %p1201_p7 = scmp.lt.s32.totalorder %s1631_s8, %s1199_s7  ;;  %p1202_p1 = scmp.lt.s32.totalorder %s1200_s20, %s1194_s10 }
 0x2c3   : > { %p1196_p5 = pnand %p1195_p4, %p1737_p13 }
 0x2c4   : > { %p1203_p8 = por %p1202_p1, %p1201_p7 }
 0x2c5   : > { %p1197_p3 = pneg %p1196_p5 }
 0x2c7   : > { %p1204_p11 = pnand %p1203_p8, %p1197_p3 }
 0x339   : > { %v595_v50 = vpop.xlane.xlu0 %594 }
 0x33a   : > { %1042 = vlog2.f32 %v595_v50 }
 0x33b   : > { %1044 = vrcp.f32 %v595_v50  ;;  %v598_v55 = vpop.xlane.xlu1 %597 }
 0x33d   : > { %v584_v51 = vpop.xlane.xlu0 %583 }
 0x33e   : > { %v585_v52 = vmul.f32 0.06666667, %v584_v51 }
 0x340   : > { %1046 = vrsqrt.f32 %v585_v52 }
 0x344   : > { %v1043_v53 = vpop.eup %1042 }
 0x345   : > { %v1045_v54 = vpop.eup %1044  ;;  %v600_v56 = vmul.f32 0.6931472, %v1043_v53 }
 0x346   : > { %v602_v57 = vmul.f32 %v1045_v54, %v598_v55 }
 0x348   : > { %v603_v58 = vsub.f32 %v600_v56, %v602_v57 }
 0x34a   : > { %v1047_v59 = vpop.eup %1046  ;;  %v604_v60 = vmul.f32 0.18033688, %v603_v58 }
 0x34b   : > { %v587_v61 = vmul.f32 %v1047_v59, %v580_v45 }
 0x34c   : > { %v605_v62 = vmul.f32 1.442695, %v604_v60 }
 0x34d   : > { %611 = vst [vmem:[%s350_s27] sm:$0xff] %v587_v61 }
 0x34e   : > { %1048 = vpow2.f32 %v605_v62 }
 0x34f   : > { %1207 = shalt.err (!%p1204_p11)
}
 0x350   : > { %s1208_s25 = scalar_lea.hbm %s1629_s19, 128  ;;  %s1212_s29 = scalar_lea.hbm %s1713_s6, 256 }
 0x351   : > { %p1209_p0 = scmp.ne.s32.totalorder %s1629_s19, %s1208_s25  ;;  %p1213_p2 = scmp.lt.u32.totalorder %s1629_s19, %s1713_s6 }
 0x352   : > { %p1214_p6 = scmp.lt.u32.totalorder %s1212_s29, %s1208_s25  ;;  %p1216_p4 = scmp.lt.u32.totalorder %s1208_s25, %s1629_s19 }
 0x353   : > { %p1210_p9 = pnand %p1209_p0, %p1737_p13 }
 0x354   : > { %p1215_p10 = por %p1214_p6, %p1213_p2 }
 0x355   : > { %p1211_p12 = pneg %p1210_p9 }
 0x356   : > { %p1217_p5 = por %p1216_p4, %p1215_p10 }
 0x358   : > { %p1218_p3 = pnand %p1217_p5, %p1211_p12 }
 0x35a   : > { %1221 = shalt.err (!%p1218_p3)
}
 0x35b   : > { %948 = dma.vmem_to_hbm [thread:$0]  (%p1737_p13), %s1631_s8, 128, %s1629_s19, %s1604_s13   ;;  %v1049_v63 = vpop.eup %1048 }
 0x35c   : > { %s336_s27 = scalar_lea.vmem [#allocation10], %s1557_s3  ;;  %v607_v0 = vmul.f32 %v1049_v63, %v587_v61  ;;  %s1661_s16 = scalar_lea.hbm %s1711_s4, %s1594_s26 }
 0x35d   : > { %s636_s14 = sshll.u32 %s336_s27, 4  ;;  %s613_s7 = scalar_lea.sflag [#allocation4], %s1554_s15  ;;  %s1663_s14 = int_to_ptr.vmem [resolvable:$true] %s636_s14 }
 0x35e   : > { %v608_v1 = vadd.f32 %v607_v0, %v1586_v31  ;;  %s1222_s20 = scalar_lea.vmem %s1663_s14, 128  ;;  %s1316_s3 = smov [#allocation10]  }
 0x35f   : > { %p1223_p7 = scmp.ne.s32.totalorder %s1663_s14, %s1222_s20  ;;  %s1226_s13 = sshll.u32 %s1316_s3, 4  ;;  %s1227_s13 = int_to_ptr.vmem [resolvable:$false] %s1226_s13 }
 0x360   : > { %609 = vst [vmem:[%s336_s27] sm:$0xff] %v608_v1  ;;  %s1228_s8 = scalar_lea.vmem %s1227_s13, 256  ;;  %p1229_p11 = scmp.lt.s32.totalorder %s1663_s14, %s1227_s13 }
 0x361   : > { %p1224_p1 = pnand %p1223_p7, %p1737_p13  ;;  %p1230_p0 = scmp.lt.s32.totalorder %s1228_s8, %s1222_s20 }
 0x363   : > { %p1225_p8 = pneg %p1224_p1  ;;  %p1231_p9 = por %p1230_p0, %p1229_p11 }
 0x365   : > { %p1232_p12 = pnand %p1231_p9, %p1225_p8 }
 0x367   : > { %1235 = shalt.err (!%p1232_p12)
}
 0x368   : > { %s1236_s15 = scalar_lea.hbm %s1661_s16, 128  ;;  %s1240_s25 = scalar_lea.hbm %s1711_s4, 256 }
 0x369   : > { %p1237_p2 = scmp.ne.s32.totalorder %s1661_s16, %s1236_s15  ;;  %p1241_p4 = scmp.lt.u32.totalorder %s1661_s16, %s1711_s4 }
 0x36a   : > { %p1242_p5 = scmp.lt.u32.totalorder %s1240_s25, %s1236_s15  ;;  %p1244_p7 = scmp.lt.u32.totalorder %s1236_s15, %s1661_s16 }
 0x36b   : > { %p1238_p6 = pnand %p1237_p2, %p1737_p13 }
 0x36c   : > { %p1243_p3 = por %p1242_p5, %p1241_p4 }
 0x36d   : > { %p1239_p10 = pneg %p1238_p6 }
 0x36e   : > { %p1245_p1 = por %p1244_p7, %p1243_p3 }
 0x370   : > { %p1246_p8 = pnand %p1245_p1, %p1239_p10 }
 0x372   : > { %1249 = shalt.err (!%p1246_p8)
}
 0x373   : > { %946 = dma.vmem_to_hbm [thread:$0]  (%p1737_p13), %s1663_s14, 128, %s1661_s16, %s613_s7  }
 0x374 PF: > { %s674_s29 = sand.u32 1, %s1292_s21   ;;  %p1738_p11 = scmp.ne.s32.totalorder %s1722_s28, 0 }
 0x375   : > { %p1739_p0 = scmp.ge.s32.totalorder %s1304_s24, 2  ;;  %s675_s18 = scalar_lea.sflag [#allocation4], %s674_s29 }
 0x377   : > { %p967_p9 = pnand %p1739_p0, %p1738_p11 }
 0x379   : > { %1283 = dma.done.wait (!%p967_p9), %s675_s18, 128  }
 0x37a   : > { %1285 = vsyncadd (!%p967_p9), %s675_s18, 4294967168  ;;  %s1740_s11 = sadd.s32 4294967294, %s1304_s24  }
 0x37b   : > { %s683_s27 = sand.u32 1, %s1740_s11  }
 0x37c   : > { %s684_s2 = scalar_lea.sflag [#allocation12], %s683_s27 }
 0x37d   : > { %1287 = dma.done.wait (!%p967_p9), %s684_s2, 256  }
 0x37e   : > { %1289 = vsyncadd (!%p967_p9), %s684_s2, 4294967040  ;;  %s1741_s12 = sld [smem:[#allocation20_spill]]  ;;  %p27_p13 = scmp.ge.s32.totalorder %s1464_s9, 4  }
 0x37f   : > { %s1742_s21 = smov %s1296_s22  ;;  %s1743_s22 = smov %s1300_s23 }
 0x380   : > { %s1745_s24 = smov %s1464_s9  ;;  %29 = sbr.rel (!%p27_p13) target bundleno = 13 (0xd), region = 134 }
 0x384   : > { %s1744_s23 = smov %s1741_s12 }
 0x387   :  { %698 = vsyncpa [#allocation3], 1 }
 0x388   :  { %700 = vsyncpa [#allocation3 + $0x1], 1 }
 0x389   :  { %701 = vsyncpa [#allocation6], 1 }
 0x38a   :  { %703 = vsyncpa [#allocation6 + $0x1], 1 }
 0x38b   :  { %704 = vsyncpa [#allocation9], 1 }
 0x38c   :  { %705 = vsyncpa [#allocation4], 1 }
 0x38d   :  { %707 = vsyncpa [#allocation4 + $0x1], 1 }
 0x38e   :  { %708 = vsyncpa [#allocation12], 1 }
 0x38f   :  { %710 = vsyncpa [#allocation12 + $0x1], 1 }

</bundles_post_ra>
